<compile_context>
chip_gen: v5e
topology: v5e:2x2
jax: 0.10.0
libtpu: 0.0.40
codegen_flags: <defaults>
</compile_context>

<pallas_src>
import jax
import jax.numpy as jnp
from jax import lax
from jax.experimental import pallas as pl
from jax.experimental.pallas import tpu as pltpu


def _round_up(n, m):
    return ((n + m - 1) // m) * m


def make_rnn_noun_kernel(T, TB, Hp, Op, H_real, O_real):
    """Kernel for one batch tile of TB rows; all shapes static & padded."""

    def kernel(x_ref, wca_ref, whh_ref, wfca_ref, out1_ref, out2_ref, out3_ref):
        # x_ref   : (T, TB, Ia)  time-major input, ones column folded in at col I
        # wca_ref : (Ia, Hp)     w_dense@w_ih with the combined bias in row I
        # whh_ref : (Hp, Hp)     recurrent weight (padded rows/cols are zero)
        # wfca_ref: (Hp, Op)     fc weight with b_fc in (padded, zero) row H_real
        wca = wca_ref[...]
        whh = whh_ref[...]

        # ---- tanh recurrence, statically unrolled (T small & known).
        # The x_t @ wca matmul is independent of the serial h-chain, so the
        # scheduler can overlap it with the previous step's tanh/add.
        h = jnp.zeros((TB, Hp), jnp.float32)
        for t in range(T):                                   # static unroll
            pre_t = jnp.dot(x_ref[t], wca,
                            preferred_element_type=jnp.float32)      # (TB, Hp)
            h = jnp.tanh(pre_t + jnp.dot(h, whh,
                                         preferred_element_type=jnp.float32))

        # ---- out1 = last hidden state (padded lanes are exactly 0).
        out1_ref[...] = h

        # ---- fc with folded bias: padded lane H_real of h is 0 by construction;
        #      flip it to 1 so row H_real of wfca (which holds b_fc) is added.
        hcol = lax.broadcasted_iota(jnp.int32, (TB, Hp), 1)
        h_aug = jnp.where(hcol == H_real, jnp.float32(1.0), h)
        logits = jnp.dot(h_aug, wfca_ref[...],
                         preferred_element_type=jnp.float32)          # (TB, Op)
        out2_ref[...] = logits

        # ---- masked log-softmax over the REAL class columns (f32 throughout).
        # Single iota + single where; `masked` feeds both the max and the sum
        # (exp(-1e30 - m) underflows to 0 in f32, so padded lanes drop out).
        omask = lax.broadcasted_iota(jnp.int32, (TB, Op), 1) < O_real
        neg_inf = jnp.float32(-1e30)
        masked = jnp.where(omask, logits, neg_inf)
        m = jnp.max(masked, axis=1, keepdims=True)
        s = jnp.sum(jnp.exp(masked - m), axis=1, keepdims=True)
        # Padded out3 lanes hold garbage; wrapper always slices [:B, :O].
        out3_ref[...] = (logits - m) - jnp.log(s)

    return kernel


def rnn_noun_forward(x, params):
    """x: (B, T, I) batch-first, like the PyTorch module. Returns (out1, out2, out3)."""
    B, T, I = x.shape
    H = params["w_dense"].shape[1]
    O = params["w_fc"].shape[1]

    # Padded, lane/sublane-dense shapes.  Hp reserves at least one spare lane
    # beyond H so the fc bias can live in a hidden lane that h keeps at zero.
    TB = 8                                           # batch tile (sublane-dense)
    Bp = _round_up(max(B, TB), TB)
    Hp = _round_up(max(H + 1, 128), 128)
    Op = _round_up(max(O, 128), 128)
    Ia = _round_up(I + 1, 8)                         # input cols + ones column

    f32 = jnp.float32

    # ---- Algebraic fusion of dense + RNN input projection (wrapper-side, f32).
    w_comb = params["w_dense"] @ params["w_ih"]                                      # (I, H)
    b_comb = params["b_dense"] @ params["w_ih"] + params["b_ih"] + params["b_hh"]    # (1, H)

    # Combined-input weight with the bias folded into row I (ones-column trick).
    wca = jnp.zeros((Ia, Hp), f32)
    wca = wca.at[:I, :H].set(w_comb.astype(f32))
    wca = wca.at[I, :H].set(b_comb[0].astype(f32))

    # Recurrent weight, zero-padded so padded hidden lanes stay exactly 0.
    whh = jnp.zeros((Hp, Hp), f32).at[:H, :H].set(params["w_hh"].astype(f32))

    # fc weight with b_fc folded into (padded, zero-in-h) row H.
    wfca = jnp.zeros((Hp, Op), f32)
    wfca = wfca.at[:H, :O].set(params["w_fc"].astype(f32))
    wfca = wfca.at[H, :O].set(params["b_fc"][0].astype(f32))

    # ---- Time-major layout + batch pad + ones column (HBM-side by XLA).
    # TODO(synk): for large B*T*I, replace this materialized transpose/pad with
    # a BlockSpec index_map over a time grid axis reading the batch-major layout.
    x_tm = jnp.transpose(x, (1, 0, 2)).astype(f32)                    # (T, B, I)
    x_tm = jnp.pad(x_tm, ((0, 0), (0, Bp - B), (0, 0)))               # (T, Bp, I)
    ones = jnp.ones((T, Bp, 1), f32)
    x_aug = jnp.concatenate([x_tm, ones], axis=-1)                    # (T, Bp, I+1)
    x_aug = jnp.pad(x_aug, ((0, 0), (0, 0), (0, Ia - (I + 1))))       # (T, Bp, Ia)

    kernel = make_rnn_noun_kernel(T, TB, Hp, Op, H, O)

    grid = (Bp // TB,)   # batch-parallel; splits across TCs on v7x, loop on v5e/v6e
    in_specs = [
        pl.BlockSpec((T, TB, Ia), lambda b: (0, b, 0)),   # per-tile input slab
        pl.BlockSpec((Ia, Hp), lambda b: (0, 0)),          # weights: full, re-used
        pl.BlockSpec((Hp, Hp), lambda b: (0, 0)),
        pl.BlockSpec((Hp, Op), lambda b: (0, 0)),
    ]
    out_specs = [
        pl.BlockSpec((TB, Hp), lambda b: (b, 0)),
        pl.BlockSpec((TB, Op), lambda b: (b, 0)),
        pl.BlockSpec((TB, Op), lambda b: (b, 0)),
    ]
    out_shapes = (
        jax.ShapeDtypeStruct((Bp, Hp), f32),   # out1 (padded)
        jax.ShapeDtypeStruct((Bp, Op), f32),   # out2 (padded)
        jax.ShapeDtypeStruct((Bp, Op), f32),   # out3 (padded)
    )

    o1p, o2p, o3p = pl.pallas_call(
        kernel,
        out_shape=out_shapes,
        grid=grid,
        in_specs=in_specs,
        out_specs=out_specs,
        compiler_params=pltpu.CompilerParams(dimension_semantics=("parallel",)),
    )(x_aug, wca, whh, wfca)

    # Slice away padding (padded out3 lanes are garbage by design).
    return o1p[:B, :H], o2p[:B, :O], o3p[:B, :O]


def init_params(key, input_size, hidden_size, output_size):
    """Deterministic synthetic parameters (shapes from RNNNoun.__init__)."""
    ks = jax.random.split(key, 8)

    def uni(k, shape, fan_in):
        bound = 1.0 / jnp.sqrt(fan_in)
        return jax.random.uniform(k, shape, jnp.float32, -bound, bound)

    return {
        # nn.Linear(input_size, hidden_size)  -> stored (in, out)
        "w_dense": uni(ks[0], (input_size, hidden_size), input_size),
        "b_dense": uni(ks[1], (1, hidden_size), input_size),
        # nn.RNN(hidden_size, hidden_size), single layer, tanh
        "w_ih": uni(ks[2], (hidden_size, hidden_size), hidden_size),
        "b_ih": uni(ks[3], (1, hidden_size), hidden_size),
        "w_hh": uni(ks[4], (hidden_size, hidden_size), hidden_size),
        "b_hh": uni(ks[5], (1, hidden_size), hidden_size),
        # nn.Linear(hidden_size, output_size)
        "w_fc": uni(ks[6], (hidden_size, output_size), hidden_size),
        "b_fc": uni(ks[7], (1, output_size), hidden_size),
    }


def reference_forward(x, p):
    """Pure-JAX reference matching the PyTorch module semantics (unfused, f32)."""
    B, T, I = x.shape
    H = p["w_dense"].shape[1]
    xp = jnp.einsum("bti,ih->bth", x, p["w_dense"]) + p["b_dense"][0]
    h = jnp.zeros((B, H), jnp.float32)
    for t in range(T):
        h = jnp.tanh(xp[:, t, :] @ p["w_ih"] + p["b_ih"][0]
                     + h @ p["w_hh"] + p["b_hh"][0])
    out1 = h
    out2 = out1 @ p["w_fc"] + p["b_fc"][0]
    out3 = jax.nn.log_softmax(out2, axis=1)
    return out1, out2, out3


if __name__ == "__main__":
    batch, seq, input_size, hidden_size, output_size = 2, 8, 16, 32, 8

    key = jax.random.PRNGKey(0)
    k_x, k_p = jax.random.split(key)
    x = jax.random.normal(k_x, (batch, seq, input_size), jnp.float32)
    params = init_params(k_p, input_size, hidden_size, output_size)

    out1, out2, out3 = rnn_noun_forward(x, params)
    jax.block_until_ready((out1, out2, out3))

    r1, r2, r3 = reference_forward(x, params)
    assert jnp.allclose(out1, r1, atol=1e-3, rtol=1e-3)
    assert jnp.allclose(out2, r2, atol=1e-3, rtol=1e-3)
    assert jnp.allclose(out3, r3, atol=1e-3, rtol=1e-3)

    print("KERNEL_OK")
</pallas_src>

<mosaic_0001>
module attributes {stable_mosaic.version = 11 : i64} {
  func.func @kernel(%arg0: i32, %arg1: memref<8x8x24xf32, #tpu.memory_space<vmem>>, %arg2: memref<24x128xf32, #tpu.memory_space<vmem>>, %arg3: memref<128x128xf32, #tpu.memory_space<vmem>>, %arg4: memref<128x128xf32, #tpu.memory_space<vmem>>, %arg5: memref<8x128xf32, #tpu.memory_space<vmem>>, %arg6: memref<8x128xf32, #tpu.memory_space<vmem>>, %arg7: memref<8x128xf32, #tpu.memory_space<vmem>>) attributes {dimension_semantics = [#tpu.dimension_semantics<parallel>], iteration_bounds = array<i64: 1>, scalar_prefetch = 0 : i64, scratch_operands = 0 : i64, tpu.core_type = #tpu.core_type<tc>, window_params = [{transform_indices = @transform_0, window_bounds = array<i64: 8, 8, 24>}, {pipeline_mode = #tpu.pipeline_mode<synchronous>, transform_indices = @transform_1, window_bounds = array<i64: 24, 128>}, {pipeline_mode = #tpu.pipeline_mode<synchronous>, transform_indices = @transform_2, window_bounds = array<i64: 128, 128>}, {pipeline_mode = #tpu.pipeline_mode<synchronous>, transform_indices = @transform_3, window_bounds = array<i64: 128, 128>}, {transform_indices = @transform_4, window_bounds = array<i64: 8, 128>}, {transform_indices = @transform_5, window_bounds = array<i64: 8, 128>}, {transform_indices = @transform_6, window_bounds = array<i64: 8, 128>}]} {
    %c0 = arith.constant 0 : index
    %c0_0 = arith.constant 0 : index
    %0 = vector.load %arg2[%c0, %c0_0] : memref<24x128xf32, #tpu.memory_space<vmem>>, vector<24x128xf32>
    %c0_1 = arith.constant 0 : index
    %c0_2 = arith.constant 0 : index
    %1 = vector.load %arg3[%c0_1, %c0_2] : memref<128x128xf32, #tpu.memory_space<vmem>>, vector<128x128xf32>
    %cst = arith.constant 0.000000e+00 : f32
    %2 = vector.broadcast %cst : f32 to vector<8x128xf32>
    %c0_3 = arith.constant 0 : index
    %c0_4 = arith.constant 0 : index
    %c0_5 = arith.constant 0 : index
    %3 = vector.load %arg1[%c0_3, %c0_4, %c0_5] : memref<8x8x24xf32, #tpu.memory_space<vmem>>, vector<1x8x24xf32>
    %4 = vector.shape_cast %3 : vector<1x8x24xf32> to vector<8x24xf32>
    %cst_6 = arith.constant dense<0.000000e+00> : vector<8x128xf32>
    %5 = tpu.matmul %4, %0, %cst_6 {dimension_numbers = #tpu.dot_dimension_numbers<[1], [0], [0], [1], [0, 0, 1, 1], [], []>} : vector<8x24xf32>, vector<24x128xf32>, vector<8x128xf32> -> vector<8x128xf32>
    %cst_7 = arith.constant dense<0.000000e+00> : vector<8x128xf32>
    %6 = tpu.matmul %2, %1, %cst_7 {dimension_numbers = #tpu.dot_dimension_numbers<[1], [0], [0], [1], [0, 0, 1, 1], [], []>} : vector<8x128xf32>, vector<128x128xf32>, vector<8x128xf32> -> vector<8x128xf32>
    %7 = arith.addf %5, %6 : vector<8x128xf32>
    %8 = math.tanh %7 : vector<8x128xf32>
    %c1 = arith.constant 1 : index
    %c0_8 = arith.constant 0 : index
    %c0_9 = arith.constant 0 : index
    %9 = vector.load %arg1[%c1, %c0_8, %c0_9] : memref<8x8x24xf32, #tpu.memory_space<vmem>>, vector<1x8x24xf32>
    %10 = vector.shape_cast %9 : vector<1x8x24xf32> to vector<8x24xf32>
    %cst_10 = arith.constant dense<0.000000e+00> : vector<8x128xf32>
    %11 = tpu.matmul %10, %0, %cst_10 {dimension_numbers = #tpu.dot_dimension_numbers<[1], [0], [0], [1], [0, 0, 1, 1], [], []>} : vector<8x24xf32>, vector<24x128xf32>, vector<8x128xf32> -> vector<8x128xf32>
    %cst_11 = arith.constant dense<0.000000e+00> : vector<8x128xf32>
    %12 = tpu.matmul %8, %1, %cst_11 {dimension_numbers = #tpu.dot_dimension_numbers<[1], [0], [0], [1], [0, 0, 1, 1], [], []>} : vector<8x128xf32>, vector<128x128xf32>, vector<8x128xf32> -> vector<8x128xf32>
    %13 = arith.addf %11, %12 : vector<8x128xf32>
    %14 = math.tanh %13 : vector<8x128xf32>
    %c2 = arith.constant 2 : index
    %c0_12 = arith.constant 0 : index
    %c0_13 = arith.constant 0 : index
    %15 = vector.load %arg1[%c2, %c0_12, %c0_13] : memref<8x8x24xf32, #tpu.memory_space<vmem>>, vector<1x8x24xf32>
    %16 = vector.shape_cast %15 : vector<1x8x24xf32> to vector<8x24xf32>
    %cst_14 = arith.constant dense<0.000000e+00> : vector<8x128xf32>
    %17 = tpu.matmul %16, %0, %cst_14 {dimension_numbers = #tpu.dot_dimension_numbers<[1], [0], [0], [1], [0, 0, 1, 1], [], []>} : vector<8x24xf32>, vector<24x128xf32>, vector<8x128xf32> -> vector<8x128xf32>
    %cst_15 = arith.constant dense<0.000000e+00> : vector<8x128xf32>
    %18 = tpu.matmul %14, %1, %cst_15 {dimension_numbers = #tpu.dot_dimension_numbers<[1], [0], [0], [1], [0, 0, 1, 1], [], []>} : vector<8x128xf32>, vector<128x128xf32>, vector<8x128xf32> -> vector<8x128xf32>
    %19 = arith.addf %17, %18 : vector<8x128xf32>
    %20 = math.tanh %19 : vector<8x128xf32>
    %c3 = arith.constant 3 : index
    %c0_16 = arith.constant 0 : index
    %c0_17 = arith.constant 0 : index
    %21 = vector.load %arg1[%c3, %c0_16, %c0_17] : memref<8x8x24xf32, #tpu.memory_space<vmem>>, vector<1x8x24xf32>
    %22 = vector.shape_cast %21 : vector<1x8x24xf32> to vector<8x24xf32>
    %cst_18 = arith.constant dense<0.000000e+00> : vector<8x128xf32>
    %23 = tpu.matmul %22, %0, %cst_18 {dimension_numbers = #tpu.dot_dimension_numbers<[1], [0], [0], [1], [0, 0, 1, 1], [], []>} : vector<8x24xf32>, vector<24x128xf32>, vector<8x128xf32> -> vector<8x128xf32>
    %cst_19 = arith.constant dense<0.000000e+00> : vector<8x128xf32>
    %24 = tpu.matmul %20, %1, %cst_19 {dimension_numbers = #tpu.dot_dimension_numbers<[1], [0], [0], [1], [0, 0, 1, 1], [], []>} : vector<8x128xf32>, vector<128x128xf32>, vector<8x128xf32> -> vector<8x128xf32>
    %25 = arith.addf %23, %24 : vector<8x128xf32>
    %26 = math.tanh %25 : vector<8x128xf32>
    %c4 = arith.constant 4 : index
    %c0_20 = arith.constant 0 : index
    %c0_21 = arith.constant 0 : index
    %27 = vector.load %arg1[%c4, %c0_20, %c0_21] : memref<8x8x24xf32, #tpu.memory_space<vmem>>, vector<1x8x24xf32>
    %28 = vector.shape_cast %27 : vector<1x8x24xf32> to vector<8x24xf32>
    %cst_22 = arith.constant dense<0.000000e+00> : vector<8x128xf32>
    %29 = tpu.matmul %28, %0, %cst_22 {dimension_numbers = #tpu.dot_dimension_numbers<[1], [0], [0], [1], [0, 0, 1, 1], [], []>} : vector<8x24xf32>, vector<24x128xf32>, vector<8x128xf32> -> vector<8x128xf32>
    %cst_23 = arith.constant dense<0.000000e+00> : vector<8x128xf32>
    %30 = tpu.matmul %26, %1, %cst_23 {dimension_numbers = #tpu.dot_dimension_numbers<[1], [0], [0], [1], [0, 0, 1, 1], [], []>} : vector<8x128xf32>, vector<128x128xf32>, vector<8x128xf32> -> vector<8x128xf32>
    %31 = arith.addf %29, %30 : vector<8x128xf32>
    %32 = math.tanh %31 : vector<8x128xf32>
    %c5 = arith.constant 5 : index
    %c0_24 = arith.constant 0 : index
    %c0_25 = arith.constant 0 : index
    %33 = vector.load %arg1[%c5, %c0_24, %c0_25] : memref<8x8x24xf32, #tpu.memory_space<vmem>>, vector<1x8x24xf32>
    %34 = vector.shape_cast %33 : vector<1x8x24xf32> to vector<8x24xf32>
    %cst_26 = arith.constant dense<0.000000e+00> : vector<8x128xf32>
    %35 = tpu.matmul %34, %0, %cst_26 {dimension_numbers = #tpu.dot_dimension_numbers<[1], [0], [0], [1], [0, 0, 1, 1], [], []>} : vector<8x24xf32>, vector<24x128xf32>, vector<8x128xf32> -> vector<8x128xf32>
    %cst_27 = arith.constant dense<0.000000e+00> : vector<8x128xf32>
    %36 = tpu.matmul %32, %1, %cst_27 {dimension_numbers = #tpu.dot_dimension_numbers<[1], [0], [0], [1], [0, 0, 1, 1], [], []>} : vector<8x128xf32>, vector<128x128xf32>, vector<8x128xf32> -> vector<8x128xf32>
    %37 = arith.addf %35, %36 : vector<8x128xf32>
    %38 = math.tanh %37 : vector<8x128xf32>
    %c6 = arith.constant 6 : index
    %c0_28 = arith.constant 0 : index
    %c0_29 = arith.constant 0 : index
    %39 = vector.load %arg1[%c6, %c0_28, %c0_29] : memref<8x8x24xf32, #tpu.memory_space<vmem>>, vector<1x8x24xf32>
    %40 = vector.shape_cast %39 : vector<1x8x24xf32> to vector<8x24xf32>
    %cst_30 = arith.constant dense<0.000000e+00> : vector<8x128xf32>
    %41 = tpu.matmul %40, %0, %cst_30 {dimension_numbers = #tpu.dot_dimension_numbers<[1], [0], [0], [1], [0, 0, 1, 1], [], []>} : vector<8x24xf32>, vector<24x128xf32>, vector<8x128xf32> -> vector<8x128xf32>
    %cst_31 = arith.constant dense<0.000000e+00> : vector<8x128xf32>
    %42 = tpu.matmul %38, %1, %cst_31 {dimension_numbers = #tpu.dot_dimension_numbers<[1], [0], [0], [1], [0, 0, 1, 1], [], []>} : vector<8x128xf32>, vector<128x128xf32>, vector<8x128xf32> -> vector<8x128xf32>
    %43 = arith.addf %41, %42 : vector<8x128xf32>
    %44 = math.tanh %43 : vector<8x128xf32>
    %c7 = arith.constant 7 : index
    %c0_32 = arith.constant 0 : index
    %c0_33 = arith.constant 0 : index
    %45 = vector.load %arg1[%c7, %c0_32, %c0_33] : memref<8x8x24xf32, #tpu.memory_space<vmem>>, vector<1x8x24xf32>
    %46 = vector.shape_cast %45 : vector<1x8x24xf32> to vector<8x24xf32>
    %cst_34 = arith.constant dense<0.000000e+00> : vector<8x128xf32>
    %47 = tpu.matmul %46, %0, %cst_34 {dimension_numbers = #tpu.dot_dimension_numbers<[1], [0], [0], [1], [0, 0, 1, 1], [], []>} : vector<8x24xf32>, vector<24x128xf32>, vector<8x128xf32> -> vector<8x128xf32>
    %cst_35 = arith.constant dense<0.000000e+00> : vector<8x128xf32>
    %48 = tpu.matmul %44, %1, %cst_35 {dimension_numbers = #tpu.dot_dimension_numbers<[1], [0], [0], [1], [0, 0, 1, 1], [], []>} : vector<8x128xf32>, vector<128x128xf32>, vector<8x128xf32> -> vector<8x128xf32>
    %49 = arith.addf %47, %48 : vector<8x128xf32>
    %50 = math.tanh %49 : vector<8x128xf32>
    %c0_36 = arith.constant 0 : index
    %c0_37 = arith.constant 0 : index
    %51 = vector.load %arg5[%c0_36, %c0_37] : memref<8x128xf32, #tpu.memory_space<vmem>>, vector<8x128xf32>
    tpu.vector_store %arg5[%c0_36, %c0_37], %50 {strides = array<i32>} : memref<8x128xf32, #tpu.memory_space<vmem>>, vector<8x128xf32>,
    %52 = tpu.iota {dimensions = array<i32: 1>} : vector<8x128xi32>
    %c32_i32 = arith.constant 32 : i32
    %53 = vector.broadcast %c32_i32 : i32 to vector<8x128xi32>
    %54 = arith.cmpi eq, %52, %53 : vector<8x128xi32>
    %cst_38 = arith.constant 1.000000e+00 : f32
    %55 = vector.broadcast %cst_38 : f32 to vector<8x128xf32>
    %56 = arith.select %54, %55, %50 : vector<8x128xi1>, vector<8x128xf32>
    %c0_39 = arith.constant 0 : index
    %c0_40 = arith.constant 0 : index
    %57 = vector.load %arg4[%c0_39, %c0_40] : memref<128x128xf32, #tpu.memory_space<vmem>>, vector<128x128xf32>
    %cst_41 = arith.constant dense<0.000000e+00> : vector<8x128xf32>
    %58 = tpu.matmul %56, %57, %cst_41 {dimension_numbers = #tpu.dot_dimension_numbers<[1], [0], [0], [1], [0, 0, 1, 1], [], []>} : vector<8x128xf32>, vector<128x128xf32>, vector<8x128xf32> -> vector<8x128xf32>
    %c0_42 = arith.constant 0 : index
    %c0_43 = arith.constant 0 : index
    %59 = vector.load %arg6[%c0_42, %c0_43] : memref<8x128xf32, #tpu.memory_space<vmem>>, vector<8x128xf32>
    tpu.vector_store %arg6[%c0_42, %c0_43], %58 {strides = array<i32>} : memref<8x128xf32, #tpu.memory_space<vmem>>, vector<8x128xf32>,
    %60 = tpu.iota {dimensions = array<i32: 1>} : vector<8x128xi32>
    %c8_i32 = arith.constant 8 : i32
    %61 = vector.broadcast %c8_i32 : i32 to vector<8x128xi32>
    %62 = arith.cmpi slt, %60, %61 : vector<8x128xi32>
    %cst_44 = arith.constant -1.000000e+30 : f32
    %63 = vector.broadcast %cst_44 : f32 to vector<8x128xf32>
    %64 = arith.select %62, %58, %63 : vector<8x128xi1>, vector<8x128xf32>
    %cst_45 = arith.constant dense<0xFF800000> : vector<8xf32>
    %65 = vector.multi_reduction <maximumf>, %64, %cst_45 [1] : vector<8x128xf32> to vector<8xf32>
    %66 = vector.shape_cast %65 : vector<8xf32> to vector<8x1xf32>
    %67 = vector.broadcast %66 : vector<8x1xf32> to vector<8x128xf32>
    %68 = arith.subf %64, %67 : vector<8x128xf32>
    %69 = math.exp %68 : vector<8x128xf32>
    %cst_46 = arith.constant dense<0.000000e+00> : vector<8xf32>
    %70 = vector.multi_reduction <add>, %69, %cst_46 [1] : vector<8x128xf32> to vector<8xf32>
    %71 = vector.shape_cast %70 : vector<8xf32> to vector<8x1xf32>
    %72 = vector.broadcast %66 : vector<8x1xf32> to vector<8x128xf32>
    %73 = arith.subf %58, %72 : vector<8x128xf32>
    %74 = math.log %71 : vector<8x1xf32>
    %75 = vector.broadcast %74 : vector<8x1xf32> to vector<8x128xf32>
    %76 = arith.subf %73, %75 : vector<8x128xf32>
    %c0_47 = arith.constant 0 : index
    %c0_48 = arith.constant 0 : index
    %77 = vector.load %arg7[%c0_47, %c0_48] : memref<8x128xf32, #tpu.memory_space<vmem>>, vector<8x128xf32>
    tpu.vector_store %arg7[%c0_47, %c0_48], %76 {strides = array<i32>} : memref<8x128xf32, #tpu.memory_space<vmem>>, vector<8x128xf32>,
    return
  }
  func.func @transform_0(%arg0: i32) -> (i32, i32, i32) {
    %c0_i32 = arith.constant 0 : i32
    %c0_i32_0 = arith.constant 0 : i32
    %c0_i32_1 = arith.constant 0 : i32
    return %c0_i32, %arg0, %c0_i32_0 : i32, i32, i32
  }
  func.func @transform_1(%arg0: i32) -> (i32, i32) {
    %c0_i32 = arith.constant 0 : i32
    %c0_i32_0 = arith.constant 0 : i32
    %c0_i32_1 = arith.constant 0 : i32
    return %c0_i32, %c0_i32_0 : i32, i32
  }
  func.func @transform_2(%arg0: i32) -> (i32, i32) {
    %c0_i32 = arith.constant 0 : i32
    %c0_i32_0 = arith.constant 0 : i32
    %c0_i32_1 = arith.constant 0 : i32
    return %c0_i32, %c0_i32_0 : i32, i32
  }
  func.func @transform_3(%arg0: i32) -> (i32, i32) {
    %c0_i32 = arith.constant 0 : i32
    %c0_i32_0 = arith.constant 0 : i32
    %c0_i32_1 = arith.constant 0 : i32
    return %c0_i32, %c0_i32_0 : i32, i32
  }
  func.func @transform_4(%arg0: i32) -> (i32, i32) {
    %c0_i32 = arith.constant 0 : i32
    %c0_i32_0 = arith.constant 0 : i32
    return %arg0, %c0_i32 : i32, i32
  }
  func.func @transform_5(%arg0: i32) -> (i32, i32) {
    %c0_i32 = arith.constant 0 : i32
    %c0_i32_0 = arith.constant 0 : i32
    return %arg0, %c0_i32 : i32, i32
  }
  func.func @transform_6(%arg0: i32) -> (i32, i32) {
    %c0_i32 = arith.constant 0 : i32
    %c0_i32_0 = arith.constant 0 : i32
    return %arg0, %c0_i32 : i32, i32
  }
}

</mosaic_0001>

<bundles_post_ra>
// kernel: tpu_custom_call.1
= control target key start
LH: loop header
LB: loop body
LE: loop exit
PB: predicated region body
PF: predicated region fallthrough
CT: control target
= control target key end

     0   :  { %12 = vsyncpa [#allocation3], 0  ;;  %s1058_s0 = inlined_call_operand.hbm [shape: f32[8,8,24], index: 0, kind: input, shape index: {}]   ;;  %s1059_s1 = inlined_call_operand.hbm [shape: f32[24,128], index: 1, kind: input, shape index: {}]   ;;  %s1060_s2 = inlined_call_operand.hbm [shape: f32[128,128], index: 2, kind: input, shape index: {}]   ;;  %s1061_s3 = inlined_call_operand.hbm [shape: f32[128,128], index: 3, kind: input, shape index: {}]   ;;  %s1062_s4 = inlined_call_operand.hbm [shape: f32[8,128], index: 4, kind: output, shape index: {0}]   ;;  %s1063_s5 = inlined_call_operand.hbm [shape: f32[8,128], index: 5, kind: output, shape index: {1}]   ;;  %s1064_s6 = inlined_call_operand.hbm [shape: f32[8,128], index: 6, kind: output, shape index: {2}]  }
   0x1   :  { %13 = vsyncpa [#allocation6], 0 }
   0x2   :  { %14 = vsyncpa [#allocation9], 0 }
   0x3   :  { %15 = vsyncpa [#allocation4], 0 }
   0x4   :  { %16 = vsyncpa [#allocation12], 0  ;;  %s34_s23 = sshll.u32 %s1059_s1, 4  ;;  %s794_s24 = smov [#allocation5]   ;;  %s35_s23 = int_to_ptr.hbm [resolvable:$true] %s34_s23 }
   0x5   :  { %s36_s25 = sshll.u32 %s794_s24, 4  ;;  %s21_s28 = sshll.u32 %s1058_s0, 4  ;;  %s37_s25 = int_to_ptr.vmem [resolvable:$true] %s36_s25  ;;  %s22_s28 = int_to_ptr.hbm [resolvable:$true] %s21_s28 }
   0x6   :  { %s795_s29 = smov 128   ;;  %s796_s30 = smov 8  }
   0x7   :  { %42 = dma.hbm_to_vmem [thread:$0]  %s35_s23, 384, %s37_s25, [#allocation6], %s795_s29, %s795_s29, %s796_s30  }
   0x8   :  { %s797_s7 = smov [#allocation2]   ;;  %s47_s11 = sshll.u32 %s1060_s2, 4  ;;  %s48_s11 = int_to_ptr.hbm [resolvable:$true] %s47_s11 }
   0x9   :  { %s23_s8 = sshll.u32 %s797_s7, 4  ;;  %s60_s13 = sshll.u32 %s1061_s3, 4  ;;  %s24_s8 = int_to_ptr.vmem [resolvable:$true] %s23_s8  ;;  %s61_s13 = int_to_ptr.hbm [resolvable:$true] %s60_s13 }
   0xa   :  { %29 = dma.hbm_to_vmem [thread:$0]  %s22_s28, 1024, %s24_s8, [#allocation3], %s795_s29, %s795_s29, %s796_s30  }
   0xb   :  { %s798_s14 = smov [#allocation7]   ;;  %s799_s0 = smov [#allocation8]  }
   0xc   :  { %s49_s15 = sshll.u32 %s798_s14, 4  ;;  %s62_s16 = sshll.u32 %s799_s0, 4  ;;  %s50_s15 = int_to_ptr.vmem [resolvable:$true] %s49_s15  ;;  %s63_s16 = int_to_ptr.vmem [resolvable:$true] %s62_s16 }
   0xd   :  { %55 = dma.hbm_to_vmem [thread:$0]  %s48_s11, 2048, %s50_s15, [#allocation6], %s795_s29, %s795_s29, %s796_s30  }
   0xe   :  { %68 = dma.hbm_to_vmem [thread:$0]  %s61_s13, 2048, %s63_s16, [#allocation9], %s795_s29, %s795_s29, %s796_s30  }
   0xf   :  { %784 = dma.done.wait [#allocation3], 1024  }
  0x10   :  { %785 = vsyncadd [#allocation3], 4294966272 }
  0x11   :  { %786 = dma.done.wait [#allocation6], 2432  }
  0x12   :  { %787 = vsyncadd [#allocation6], 4294964864 }
  0x13   :  { %788 = dma.done.wait [#allocation9], 2048  }
  0x14   :  { %789 = vsyncadd [#allocation9], 4294965248  ;;  %v851_v0 = vld [vmem:[#allocation7 + $0x78] sm:$0xff]  ;;  %v853_v1 = vld [vmem:[#allocation7 + $0x70] sm:$0xff]  ;;  %vm125_vm0 = vcmask 195584   ;;  %v800_v20 = vmov 0.0  }
  0x15   :  { %105 = vmatpush.msra.mxu0 %v851_v0  ;;  %152 = vmatpush.msra.mxu2 %v851_v0  ;;  %v857_v2 = vld [vmem:[#allocation7 + $0x68] sm:$0xff]  ;;  %v861_v3 = vld [vmem:[#allocation7 + $0x60] sm:$0xff]  ;;  %v863_v4 = vld [vmem:[#allocation5 + $0x10] sm:$0xff]  ;;  %s801_s2 = smov [#allocation11]   ;;  %s546_s19 = sshll.u32 %s1063_s5, 4  ;;  %s547_s19 = int_to_ptr.hbm [resolvable:$true] %s546_s19 }
  0x16   :  { %142 = vmatpush.msra.mxu1 %v863_v4  ;;  %v867_v5 = vld [vmem:[#allocation5 + $0x8] sm:$0xff]  ;;  %v869_v6 = vld [vmem:[#allocation7 + $0x58] sm:$0xff]  ;;  %v871_v7 = vld [vmem:[#allocation5] sm:$0xff]  ;;  %188 = vmatpush.msra.mxu3 %v863_v4  ;;  %s544_s3 = sshll.u32 %s801_s2, 4  ;;  %s535_s22 = sshll.u32 %s1062_s4, 4  ;;  %s545_s3 = int_to_ptr.vmem [resolvable:$true] %s544_s3  ;;  %s536_s22 = int_to_ptr.hbm [resolvable:$true] %s535_s22 }
  0x17   :  { %106 = vmatpush.msra.mxu0 %v853_v1  ;;  %153 = vmatpush.msra.mxu2 %v853_v1  ;;  %v104_v8 = vld [vmem:[#allocation2] sm:$0xff]  ;;  %v877_v9 = vld [vmem:[#allocation7 + $0x50] sm:$0xff]  ;;  %v889_v11 = vld [vmem:[#allocation7 + $0x40] sm:$0xff]  ;;  %s802_s23 = smov [#allocation10]   ;;  %s803_s25 = smov [#allocation13]  }
  0x18   :  { %143 = vmatpush.msra.mxu1 %v867_v5  ;;  %189 = vmatpush.msra.mxu3 %v867_v5  ;;  %v883_v10 = vld [vmem:[#allocation7 + $0x48] sm:$0xff]  ;;  %v895_v12 = vld [vmem:[#allocation7 + $0x38] sm:$0xff]  ;;  %v901_v13 = vld [vmem:[#allocation7 + $0x30] sm:$0xff]  ;;  %s533_s24 = sshll.u32 %s802_s23, 4  ;;  %s555_s26 = sshll.u32 %s803_s25, 4  ;;  %s534_s24 = int_to_ptr.vmem [resolvable:$true] %s533_s24  ;;  %s556_s26 = int_to_ptr.vmem [resolvable:$true] %s555_s26 }
  0x19   :  { %107 = vmatpush.msra.mxu0 %v857_v2  ;;  %154 = vmatpush.msra.mxu2 %v857_v2  ;;  %v907_v14 = vld [vmem:[#allocation7 + $0x28] sm:$0xff]  ;;  %v912_v15 = vld [vmem:[#allocation7 + $0x20] sm:$0xff]  ;;  %v917_v16 = vld [vmem:[#allocation7 + $0x18] sm:$0xff]  ;;  %s557_s28 = sshll.u32 %s1064_s6, 4  ;;  %s558_s28 = int_to_ptr.hbm [resolvable:$true] %s557_s28 }
  0x1a   :  { %144 = vmatpush.msra.mxu1 %v871_v7  ;;  %190 = vmatpush.msra.mxu3 %v871_v7  ;;  %v922_v17 = vld [vmem:[#allocation7 + $0x10] sm:$0xff]  ;;  %v927_v18 = vld [vmem:[#allocation7 + $0x8] sm:$0xff]  ;;  %v932_v19 = vld [vmem:[#allocation7] sm:$0xff] }
  0x1b   :  { %108 = vmatpush.msra.mxu0 %v861_v3  ;;  %155 = vmatpush.msra.mxu2 %v861_v3  ;;  %v151_v21 = vld [vmem:[#allocation2 + $0x8] sm:$0xff]  ;;  %v197_v26 = vld [vmem:[#allocation2 + $0x10] sm:$0xff]  ;;  %v243_v31 = vld [vmem:[#allocation2 + $0x18] sm:$0xff] }
  0x1c   :  { %578 = vmatmul.msk.f32.vlgmr.msra.gmra.mxu1 %vm125_vm0, %v104_v8  ;;  %234 = vmatpush.msrb.mxu3 %v863_v4  ;;  %v289_v36 = vld [vmem:[#allocation2 + $0x20] sm:$0xff]  ;;  %v335_v41 = vld [vmem:[#allocation2 + $0x28] sm:$0xff]  ;;  %v381_v46 = vld [vmem:[#allocation2 + $0x30] sm:$0xff] }
  0x1d   :  { %109 = vmatpush.msra.mxu0 %v869_v6  ;;  %156 = vmatpush.msra.mxu2 %v869_v6  ;;  %v427_v51 = vld [vmem:[#allocation2 + $0x38] sm:$0xff]  ;;  %v492_v52 = vld [vmem:[#allocation8 + $0x78] sm:$0xff]  ;;  %v491_v53 = vld [vmem:[#allocation8 + $0x70] sm:$0xff] }
  0x1e   :  { %198 = vmatpush.msrb.mxu1 %v851_v0  ;;  %235 = vmatpush.msrb.mxu3 %v867_v5  ;;  %v490_v54 = vld [vmem:[#allocation8 + $0x68] sm:$0xff]  ;;  %v489_v55 = vld [vmem:[#allocation8 + $0x60] sm:$0xff]  ;;  %v488_v56 = vld [vmem:[#allocation8 + $0x58] sm:$0xff] }
  0x1f   :  { %110 = vmatpush.msra.mxu0 %v877_v9  ;;  %157 = vmatpush.msra.mxu2 %v877_v9  ;;  %v487_v57 = vld [vmem:[#allocation8 + $0x50] sm:$0xff]  ;;  %v486_v58 = vld [vmem:[#allocation8 + $0x48] sm:$0xff]  ;;  %v485_v59 = vld [vmem:[#allocation8 + $0x40] sm:$0xff] }
  0x20   :  { %199 = vmatpush.msrb.mxu1 %v853_v1  ;;  %236 = vmatpush.msrb.mxu3 %v871_v7  ;;  %v484_v60 = vld [vmem:[#allocation8 + $0x38] sm:$0xff]  ;;  %v483_v61 = vld [vmem:[#allocation8 + $0x30] sm:$0xff] }
  0x21   :  { %111 = vmatpush.msra.mxu0 %v883_v10  ;;  %158 = vmatpush.msra.mxu2 %v883_v10 }
  0x22   :  { %200 = vmatpush.msrb.mxu1 %v857_v2  ;;  %579 = vmatmul.msk.f32.vlgmr.msra.gmra.mxu3 %vm125_vm0, %v151_v21 }
  0x23   :  { %112 = vmatpush.msra.mxu0 %v889_v11  ;;  %159 = vmatpush.msra.mxu2 %v889_v11 }
  0x24   :  { %201 = vmatpush.msrb.mxu1 %v861_v3  ;;  %244 = vmatpush.msra.mxu3 %v851_v0 }
  0x25   :  { %113 = vmatpush.msra.mxu0 %v895_v12  ;;  %160 = vmatpush.msra.mxu2 %v895_v12 }
  0x26   :  { %202 = vmatpush.msrb.mxu1 %v869_v6  ;;  %245 = vmatpush.msra.mxu3 %v853_v1 }
  0x27   :  { %114 = vmatpush.msra.mxu0 %v901_v13  ;;  %161 = vmatpush.msra.mxu2 %v901_v13 }
  0x28   :  { %203 = vmatpush.msrb.mxu1 %v877_v9  ;;  %246 = vmatpush.msra.mxu3 %v857_v2 }
  0x29   :  { %115 = vmatpush.msra.mxu0 %v907_v14  ;;  %162 = vmatpush.msra.mxu2 %v907_v14 }
  0x2a   :  { %204 = vmatpush.msrb.mxu1 %v883_v10  ;;  %247 = vmatpush.msra.mxu3 %v861_v3 }
  0x2b   :  { %116 = vmatpush.msra.mxu0 %v912_v15  ;;  %163 = vmatpush.msra.mxu2 %v912_v15 }
  0x2c   :  { %205 = vmatpush.msrb.mxu1 %v889_v11  ;;  %248 = vmatpush.msra.mxu3 %v869_v6 }
  0x2d   :  { %117 = vmatpush.msra.mxu0 %v917_v16  ;;  %164 = vmatpush.msra.mxu2 %v917_v16 }
  0x2e   :  { %206 = vmatpush.msrb.mxu1 %v895_v12  ;;  %249 = vmatpush.msra.mxu3 %v877_v9 }
  0x2f   :  { %118 = vmatpush.msra.mxu0 %v922_v17  ;;  %165 = vmatpush.msra.mxu2 %v922_v17 }
  0x30   :  { %207 = vmatpush.msrb.mxu1 %v901_v13  ;;  %250 = vmatpush.msra.mxu3 %v883_v10 }
  0x31   :  { %119 = vmatpush.msra.mxu0 %v927_v18  ;;  %166 = vmatpush.msra.mxu2 %v927_v18 }
  0x32   :  { %208 = vmatpush.msrb.mxu1 %v907_v14  ;;  %251 = vmatpush.msra.mxu3 %v889_v11 }
  0x33   :  { %120 = vmatpush.msra.mxu0 %v932_v19  ;;  %167 = vmatpush.msra.mxu2 %v932_v19 }
  0x34   :  { %121 = vmatmul.f32.vlgmr.msra.gmra.mxu0 %v800_v20  ;;  %209 = vmatpush.msrb.mxu1 %v912_v15 }
  0x35   :  { %280 = vmatpush.msrb.mxu2 %v863_v4  ;;  %336 = vmatpush.msrb.mxu0 %v851_v0 }
  0x36   :  { %210 = vmatpush.msrb.mxu1 %v917_v16  ;;  %252 = vmatpush.msra.mxu3 %v895_v12 }
  0x37   :  { %281 = vmatpush.msrb.mxu2 %v867_v5  ;;  %337 = vmatpush.msrb.mxu0 %v853_v1 }
  0x38   :  { %211 = vmatpush.msrb.mxu1 %v922_v17  ;;  %253 = vmatpush.msra.mxu3 %v901_v13 }
  0x39   :  { %282 = vmatpush.msrb.mxu2 %v871_v7  ;;  %338 = vmatpush.msrb.mxu0 %v857_v2 }
  0x3a   :  { %212 = vmatpush.msrb.mxu1 %v927_v18  ;;  %254 = vmatpush.msra.mxu3 %v907_v14 }
  0x3b   :  { %339 = vmatpush.msrb.mxu0 %v861_v3  ;;  %580 = vmatmul.msk.f32.vlgmr.msrb.gmra.mxu3 %vm125_vm0, %v197_v26 }
  0x3c   :  { %213 = vmatpush.msrb.mxu1 %v932_v19  ;;  %255 = vmatpush.msra.mxu3 %v912_v15 }
  0x3d   :  { %340 = vmatpush.msrb.mxu0 %v869_v6 }
  0x3e   :  { %326 = vmatpush.msra.mxu1 %v863_v4  ;;  %256 = vmatpush.msra.mxu3 %v917_v16 }
  0x3f   :  { %341 = vmatpush.msrb.mxu0 %v877_v9 }
  0x40   :  { %327 = vmatpush.msra.mxu1 %v867_v5  ;;  %257 = vmatpush.msra.mxu3 %v922_v17 }
  0x41   :  { %342 = vmatpush.msrb.mxu0 %v883_v10 }
  0x42   :  { %328 = vmatpush.msra.mxu1 %v871_v7  ;;  %258 = vmatpush.msra.mxu3 %v927_v18 }
  0x43   :  { %343 = vmatpush.msrb.mxu0 %v889_v11 }
  0x44   :  { %259 = vmatpush.msra.mxu3 %v932_v19 }
  0x45   :  { %344 = vmatpush.msrb.mxu0 %v895_v12 }
  0x46   :  { %382 = vmatpush.msrb.mxu3 %v851_v0 }
  0x47   :  { %345 = vmatpush.msrb.mxu0 %v901_v13 }
  0x48   :  { %383 = vmatpush.msrb.mxu3 %v853_v1 }
  0x49   :  { %346 = vmatpush.msrb.mxu0 %v907_v14 }
  0x4a   :  { %384 = vmatpush.msrb.mxu3 %v857_v2 }
  0x4b   :  { %347 = vmatpush.msrb.mxu0 %v912_v15 }
  0x4c   :  { %385 = vmatpush.msrb.mxu3 %v861_v3 }
  0x4d   :  { %348 = vmatpush.msrb.mxu0 %v917_v16 }
  0x4e   :  { %386 = vmatpush.msrb.mxu3 %v869_v6 }
  0x4f   :  { %349 = vmatpush.msrb.mxu0 %v922_v17 }
  0x50   :  { %387 = vmatpush.msrb.mxu3 %v877_v9 }
  0x51   :  { %350 = vmatpush.msrb.mxu0 %v927_v18 }
  0x52   :  { %388 = vmatpush.msrb.mxu3 %v883_v10 }
  0x53   :  { %351 = vmatpush.msrb.mxu0 %v932_v19 }
  0x54   :  { %389 = vmatpush.msrb.mxu3 %v889_v11 }
  0x55   :  { %493 = vmatpush.msra.mxu0 %v492_v52 }
  0x56   :  { %390 = vmatpush.msrb.mxu3 %v895_v12 }
  0x57   :  { %494 = vmatpush.msra.mxu0 %v491_v53 }
  0x58   :  { %391 = vmatpush.msrb.mxu3 %v901_v13 }
  0x59   :  { %495 = vmatpush.msra.mxu0 %v490_v54 }
  0x5a   :  { %392 = vmatpush.msrb.mxu3 %v907_v14 }
  0x5b   :  { %496 = vmatpush.msra.mxu0 %v489_v55 }
  0x5c   :  { %393 = vmatpush.msrb.mxu3 %v912_v15 }
  0x5d   :  { %497 = vmatpush.msra.mxu0 %v488_v56 }
  0x5e   :  { %394 = vmatpush.msrb.mxu3 %v917_v16 }
  0x5f   :  { %498 = vmatpush.msra.mxu0 %v487_v57 }
  0x60   :  { %395 = vmatpush.msrb.mxu3 %v922_v17 }
  0x61   :  { %499 = vmatpush.msra.mxu0 %v486_v58 }
  0x62   :  { %396 = vmatpush.msrb.mxu3 %v927_v18 }
  0x63   :  { %500 = vmatpush.msra.mxu0 %v485_v59 }
  0x64   :  { %397 = vmatpush.msrb.mxu3 %v932_v19 }
  0x65   :  { %501 = vmatpush.msra.mxu0 %v484_v60 }
  0x67   :  { %502 = vmatpush.msra.mxu0 %v483_v61 }
  0x99   :  { %v146_v22 = vpop.f32.mrf.mxu1 }
  0xa5   :  { %v192_v27 = vpop.f32.mrf.mxu3 }
  0xb1   :  { %v122_v23 = vpop.f32.mrf.mxu0 }
  0xb2   :  { %v147_v24 = vadd.f32 %v146_v22, %v122_v23 }
  0xb4   :  { %596 = vtanh.f32 %v147_v24 }
  0xba   :  { %v597_v25 = vpop.eup %596 }
  0xbb   :  { %168 = vmatmul.f32.vlgmr.msra.gmra.mxu2 %v597_v25 }
  0xbc   :  { %290 = vmatpush.msra.mxu2 %v851_v0 }
  0xbe   :  { %291 = vmatpush.msra.mxu2 %v853_v1  ;;  %v238_v32 = vpop.f32.mrf.mxu3 }
  0xc0   :  { %292 = vmatpush.msra.mxu2 %v857_v2 }
  0xc2   :  { %293 = vmatpush.msra.mxu2 %v861_v3 }
  0xc3   :  { %581 = vmatmul.msk.f32.vlgmr.msrb.gmra.mxu2 %vm125_vm0, %v243_v31 }
  0xc4   :  { %294 = vmatpush.msra.mxu2 %v869_v6 }
  0xc6   :  { %295 = vmatpush.msra.mxu2 %v877_v9 }
  0xc8   :  { %296 = vmatpush.msra.mxu2 %v883_v10 }
  0xca   :  { %297 = vmatpush.msra.mxu2 %v889_v11 }
  0xcc   :  { %298 = vmatpush.msra.mxu2 %v895_v12 }
  0xce   :  { %299 = vmatpush.msra.mxu2 %v901_v13 }
  0xd0   :  { %300 = vmatpush.msra.mxu2 %v907_v14 }
  0xd2   :  { %301 = vmatpush.msra.mxu2 %v912_v15 }
  0xd4   :  { %302 = vmatpush.msra.mxu2 %v917_v16 }
  0xd6   :  { %303 = vmatpush.msra.mxu2 %v922_v17 }
  0xd8   :  { %304 = vmatpush.msra.mxu2 %v927_v18 }
  0xda   :  { %305 = vmatpush.msra.mxu2 %v932_v19 }
  0xdc   :  { %464 = vmatpush.msrb.mxu2 %v863_v4 }
  0xde   :  { %465 = vmatpush.msrb.mxu2 %v867_v5 }
  0xe0   :  { %466 = vmatpush.msrb.mxu2 %v871_v7 }
 0x13e   :  { %v169_v28 = vpop.f32.mrf.mxu2 }
 0x13f   :  { %v193_v29 = vadd.f32 %v192_v27, %v169_v28 }
 0x141   :  { %598 = vtanh.f32 %v193_v29 }
 0x146   :  { %v284_v37 = vpop.f32.mrf.mxu2 }
 0x147   :  { %v599_v30 = vpop.eup %598 }
 0x148   :  { %214 = vmatmul.f32.vlgmr.msrb.gmra.mxu1 %v599_v30 }
 0x149   :  { %372 = vmatpush.msrb.mxu1 %v863_v4 }
 0x14b   :  { %373 = vmatpush.msrb.mxu1 %v867_v5 }
 0x14d   :  { %374 = vmatpush.msrb.mxu1 %v871_v7 }
 0x150   :  { %582 = vmatmul.msk.f32.vlgmr.msra.gmra.mxu1 %vm125_vm0, %v289_v36 }
 0x151   :  { %418 = vmatpush.msra.mxu1 %v863_v4  ;;  %v480_v4 = vld [vmem:[#allocation8 + $0x18] sm:$0xff] }
 0x153   :  { %419 = vmatpush.msra.mxu1 %v867_v5  ;;  %v479_v5 = vld [vmem:[#allocation8 + $0x10] sm:$0xff] }
 0x155   :  { %420 = vmatpush.msra.mxu1 %v871_v7  ;;  %v477_v7 = vld [vmem:[#allocation8] sm:$0xff] }
 0x158   :  { %583 = vmatmul.msk.f32.vlgmr.msrb.gmra.mxu1 %vm125_vm0, %v335_v41 }
 0x159   :  { %428 = vmatpush.msrb.mxu1 %v851_v0 }
 0x15b   :  { %429 = vmatpush.msrb.mxu1 %v853_v1 }
 0x15d   :  { %430 = vmatpush.msrb.mxu1 %v857_v2  ;;  %v482_v2 = vld [vmem:[#allocation8 + $0x28] sm:$0xff] }
 0x15e   :  { %503 = vmatpush.msra.mxu0 %v482_v2 }
 0x15f   :  { %431 = vmatpush.msrb.mxu1 %v861_v3  ;;  %v481_v3 = vld [vmem:[#allocation8 + $0x20] sm:$0xff] }
 0x160   :  { %584 = vmatmul.msk.f32.vlgmr.msra.gmra.mxu1 %vm125_vm0, %v381_v46  ;;  %504 = vmatpush.msra.mxu0 %v481_v3 }
 0x161   :  { %432 = vmatpush.msrb.mxu1 %v869_v6  ;;  %v478_v6 = vld [vmem:[#allocation8 + $0x8] sm:$0xff] }
 0x162   :  { %505 = vmatpush.msra.mxu0 %v480_v4 }
 0x163   :  { %433 = vmatpush.msrb.mxu1 %v877_v9  ;;  %v473_v9 = vlaneseq }
 0x164   :  { %506 = vmatpush.msra.mxu0 %v479_v5 }
 0x165   :  { %434 = vmatpush.msrb.mxu1 %v883_v10 }
 0x166   :  { %507 = vmatpush.msra.mxu0 %v478_v6 }
 0x167   :  { %435 = vmatpush.msrb.mxu1 %v889_v11 }
 0x168   :  { %508 = vmatpush.msra.mxu0 %v477_v7 }
 0x169   :  { %436 = vmatpush.msrb.mxu1 %v895_v12  ;;  %v474_v12 = vand.u32 127, %v473_v9 }
 0x16b   :  { %437 = vmatpush.msrb.mxu1 %v901_v13  ;;  %vm475_vm1 = vcmp.eq.s32.totalorder %v474_v12, 32  ;;  %vm514_vm2 = vcmp.lt.s32.totalorder %v474_v12, 8 }
 0x16d   :  { %438 = vmatpush.msrb.mxu1 %v907_v14 }
 0x16f   :  { %439 = vmatpush.msrb.mxu1 %v912_v15 }
 0x171   :  { %440 = vmatpush.msrb.mxu1 %v917_v16 }
 0x173   :  { %441 = vmatpush.msrb.mxu1 %v922_v17 }
 0x175   :  { %442 = vmatpush.msrb.mxu1 %v927_v18 }
 0x177   :  { %443 = vmatpush.msrb.mxu1 %v932_v19 }
 0x1c5   :  { %v215_v33 = vpop.f32.mrf.mxu1 }
 0x1c6   :  { %v239_v34 = vadd.f32 %v238_v32, %v215_v33 }
 0x1c8   :  { %600 = vtanh.f32 %v239_v34 }
 0x1cd   :  { %v330_v42 = vpop.f32.mrf.mxu1 }
 0x1ce   :  { %v601_v35 = vpop.eup %600 }
 0x1cf   :  { %260 = vmatmul.f32.vlgmr.msra.gmra.mxu3 %v601_v35 }
 0x1d5   :  { %v376_v47 = vpop.f32.mrf.mxu1 }
 0x1dd   :  { %v422_v62 = vpop.f32.mrf.mxu1 }
 0x252   :  { %v261_v38 = vpop.f32.mrf.mxu3 }
 0x253   :  { %v285_v39 = vadd.f32 %v284_v37, %v261_v38 }
 0x255   :  { %602 = vtanh.f32 %v285_v39 }
 0x25b   :  { %v603_v40 = vpop.eup %602 }
 0x25c   :  { %306 = vmatmul.f32.vlgmr.msra.gmra.mxu2 %v603_v40 }
 0x264   :  { %585 = vmatmul.msk.f32.vlgmr.msrb.gmra.mxu2 %vm125_vm0, %v427_v51 }
 0x2df   :  { %v307_v43 = vpop.f32.mrf.mxu2 }
 0x2e0   :  { %v331_v44 = vadd.f32 %v330_v42, %v307_v43 }
 0x2e2   :  { %604 = vtanh.f32 %v331_v44 }
 0x2e7   :  { %v468_v8 = vpop.f32.mrf.mxu2 }
 0x2e8   :  { %v605_v45 = vpop.eup %604 }
 0x2e9   :  { %352 = vmatmul.f32.vlgmr.msrb.gmra.mxu0 %v605_v45 }
 0x366   :  { %v353_v48 = vpop.f32.mrf.mxu0 }
 0x367   :  { %v377_v49 = vadd.f32 %v376_v47, %v353_v48 }
 0x369   :  { %606 = vtanh.f32 %v377_v49 }
 0x36f   :  { %v607_v50 = vpop.eup %606 }
 0x370   :  { %398 = vmatmul.f32.vlgmr.msrb.gmra.mxu3 %v607_v50 }
 0x3f3   :  { %v399_v63 = vpop.f32.mrf.mxu3 }
 0x3f4   :  { %v423_v0 = vadd.f32 %v422_v62, %v399_v63 }
 0x3f6   :  { %608 = vtanh.f32 %v423_v0 }
 0x3fc   :  { %v609_v1 = vpop.eup %608 }
 0x3fd   :  { %444 = vmatmul.f32.vlgmr.msrb.gmra.mxu1 %v609_v1 }
 0x47a   :  { %v445_v10 = vpop.f32.mrf.mxu1 }
 0x47b   :  { %v469_v11 = vadd.f32 %v468_v8, %v445_v10 }
 0x47d   :  { %610 = vtanh.f32 %v469_v11 }
 0x483   :  { %v611_v13 = vpop.eup %610 }
 0x484   :  { %472 = vst [vmem:[#allocation10] sm:$0xff] %v611_v13  ;;  %v476_v14 = vsel %vm475_vm1, 1.0, %v611_v13 }
 0x485   :  { %509 = vmatmul.f32.vlgmr.msra.gmra.mxu0 %v476_v14  ;;  %538 = dma.vmem_to_hbm [thread:$0]  %s534_s24, 128, %s536_s22, [#allocation4]  }
 0x502   :  { %v510_v15 = vpop.f32.mrf.mxu0 }
 0x503   :  { %513 = vst [vmem:[#allocation11] sm:$0xff] %v510_v15  ;;  %v515_v16 = vsel %vm514_vm2, %v510_v15, -1e+30 }
 0x504   :  { %516 = vmax.xlane.f32.xlu0 %v515_v16  ;;  %549 = dma.vmem_to_hbm [thread:$0]  %s545_s3, 128, %s547_s19, [#allocation12]  }
 0x577   :  { %v517_v17 = vpop.xlane.xlu0 %516 }
 0x578   :  { %v518_v18 = vsub.f32 %v515_v16, %v517_v17  ;;  %v523_v23 = vsub.f32 %v510_v15, %v517_v17 }
 0x57a   :  { %v519_v19 = vmul.f32 1.442695, %v518_v18 }
 0x57c   :  { %612 = vpow2.f32 %v519_v19 }
 0x582   :  { %v613_v20 = vpop.eup %612 }
 0x583   :  { %521 = vadd.xlane.f32.xlu0 %v613_v20 }
 0x5f6   :  { %v522_v21 = vpop.xlane.xlu0 %521 }
 0x5f7   :  { %614 = vlog2.f32 %v522_v21 }
 0x5fd   :  { %v615_v22 = vpop.eup %614 }
 0x5fe   :  { %v525_v24 = vmul.f32 0.6931472, %v615_v22 }
 0x600   :  { %v526_v25 = vsub.f32 %v523_v23, %v525_v24 }
 0x602   :  { %527 = vst [vmem:[#allocation13] sm:$0xff] %v526_v25 }
 0x603   :  { %560 = dma.vmem_to_hbm [thread:$0]  %s556_s26, 128, %s558_s28, [#allocation12]  }
 0x604   :  { %790 = dma.done.wait [#allocation4], 128  }
 0x605   :  { %791 = vsyncadd [#allocation4], 4294967168 }
 0x606   :  { %792 = dma.done.wait [#allocation12], 256  }
 0x607   :  { %793 = vsyncadd [#allocation12], 4294967040 }
 0x608   :  { %573 = vsyncpa [#allocation3], 1 }
 0x609   :  { %574 = vsyncpa [#allocation6], 1 }
 0x60a   :  { %575 = vsyncpa [#allocation9], 1 }
 0x60b   :  { %576 = vsyncpa [#allocation4], 1 }
 0x60c   :  { %577 = vsyncpa [#allocation12], 1 }

</bundles_post_ra>
